<compile_context>
chip_gen: v7x
topology: tpu7x:2x2x1
jax: 0.10.0
libtpu: 0.0.40
codegen_flags: <defaults>
</compile_context>

<pallas_src>
import jax
import jax.numpy as jnp
from jax.experimental import pallas as pl
from jax.experimental.pallas import tpu as pltpu

IN_FEATURES = 28 * 28      # 784
OUT_FEATURES = 10
PADDED_OUT = 128           # lane-dense class dimension for compute only
NEG = -1e30                # "minus infinity" for padded class columns
TILE_N = 2048              # batch rows per grid step (cap)
VMEM_LIMIT_BYTES = 32 * 1024 * 1024


def netlin_kernel(x_ref, w_ref, b_ref, o_ref):
    # x_ref: (tn, 784) input dtype, w_ref: (784, 128) f32,
    # b_ref: (1, 128) f32 (padded columns = NEG), o_ref: (tn, 10) f32.
    x = x_ref[...].astype(jnp.float32)                       # cast hidden under DMA
    logits = jnp.dot(x, w_ref[...],
                     preferred_element_type=jnp.float32) + b_ref[...]
    # Numerically-stable log-softmax over the class axis. Padded columns hold
    # ~-1e30, so they never win the row max and exp() underflows them to 0.
    m = jnp.max(logits, axis=-1, keepdims=True)
    shifted = logits - m
    lse = jnp.log(jnp.sum(jnp.exp(shifted), axis=-1, keepdims=True))
    # Narrow store: only the 10 real classes go back to HBM.
    o_ref[...] = (shifted - lse)[:, :OUT_FEATURES].astype(o_ref.dtype)


def netlin_prepare_params(weight, bias):
    """One-time parameter prep (hoisted out of the forward).
    weight: (10, 784) as in torch nn.Linear; bias: (10,)."""
    w_pad = jnp.zeros((IN_FEATURES, PADDED_OUT), jnp.float32)
    w_pad = w_pad.at[:, :OUT_FEATURES].set(weight.T.astype(jnp.float32))
    b_pad = jnp.full((1, PADDED_OUT), NEG, dtype=jnp.float32)
    b_pad = b_pad.at[0, :OUT_FEATURES].set(bias.astype(jnp.float32))
    return w_pad, b_pad


def _pick_tile(n, tile_n):
    # Aim for >= 2 grid steps (keeps both v7x TCs busy and the pipeline primed)
    # while capping the tile at tile_n rows. Tiles are multiples of 8 (sublane)
    # unless a single full-array block is used.
    target = min(tile_n, ((pl.cdiv(n, 2) + 7) // 8) * 8)
    return target if target < n else n


def netlin_forward(x, w_pad, b_pad, *, tile_n=TILE_N):
    """x: (N, 1, 28, 28) (any shape with 784 trailing elements per row)."""
    n = x.shape[0]
    x_view = x.reshape(n, IN_FEATURES)                       # torch .view(-1, 784)

    tn = _pick_tile(n, tile_n)
    grid = (pl.cdiv(n, tn),)

    itemsize = jnp.dtype(x_view.dtype).itemsize
    cost = pl.CostEstimate(
        flops=2 * n * IN_FEATURES * PADDED_OUT,              # MXU does the 128-wide padded matmul
        transcendentals=n * (PADDED_OUT + 1),                # exp per lane + log per row
        bytes_accessed=(n * IN_FEATURES * itemsize           # x read
                        + n * OUT_FEATURES * 4               # narrow output write
                        + IN_FEATURES * PADDED_OUT * 4       # resident W
                        + PADDED_OUT * 4),                   # resident bias
    )

    return pl.pallas_call(
        netlin_kernel,
        out_shape=jax.ShapeDtypeStruct((n, OUT_FEATURES), jnp.float32),
        grid=grid,
        in_specs=[
            pl.BlockSpec((tn, IN_FEATURES), lambda i: (i, 0)),            # batch tile
            pl.BlockSpec((IN_FEATURES, PADDED_OUT), lambda i: (0, 0)),    # resident W
            pl.BlockSpec((1, PADDED_OUT), lambda i: (0, 0)),              # resident b
        ],
        out_specs=pl.BlockSpec((tn, OUT_FEATURES), lambda i: (i, 0)),     # narrow output
        compiler_params=pltpu.CompilerParams(
            dimension_semantics=("parallel",),    # shard tiles over v7x's 2 TCs
            vmem_limit_bytes=VMEM_LIMIT_BYTES,    # 2048-row tiles fit on v5e/v6e/v7x
        ),
        cost_estimate=cost,
    )(x_view, w_pad, b_pad)


def reference_forward(x, weight, bias):
    n = x.shape[0]
    x_view = x.reshape(n, IN_FEATURES).astype(jnp.float32)
    logits = x_view @ weight.T.astype(jnp.float32) + bias.astype(jnp.float32)
    return jax.nn.log_softmax(logits, axis=1)


if __name__ == "__main__":
    key = jax.random.PRNGKey(0)
    kx, kw, kb, kx2 = jax.random.split(key, 4)

    # Deterministic synthetic parameters (torch nn.Linear shapes: (10, 784), (10,))
    bound = 1.0 / (IN_FEATURES ** 0.5)
    weight = jax.random.uniform(kw, (OUT_FEATURES, IN_FEATURES),
                                jnp.float32, minval=-bound, maxval=bound)
    bias = jax.random.uniform(kb, (OUT_FEATURES,),
                              jnp.float32, minval=-bound, maxval=bound)
    w_pad, b_pad = netlin_prepare_params(weight, bias)       # hoisted: once per param set

    # Small batch of NCHW images (N, 1, 28, 28): single full-array tile path.
    x = jax.random.normal(kx, (2, 1, 28, 28), jnp.float32)
    out = jax.block_until_ready(netlin_forward(x, w_pad, b_pad))
    ref = reference_forward(x, weight, bias)
    assert out.shape == (2, OUT_FEATURES)
    assert jnp.allclose(out, ref, atol=1e-5, rtol=1e-5)

    # Multi-tile grid path with a partial last tile (1050 -> tiles of 528 + 522).
    x2 = jax.random.normal(kx2, (1050, 1, 28, 28), jnp.float32)
    out2 = jax.block_until_ready(netlin_forward(x2, w_pad, b_pad))
    ref2 = reference_forward(x2, weight, bias)
    assert out2.shape == (1050, OUT_FEATURES)
    assert jnp.allclose(out2, ref2, atol=1e-5, rtol=1e-5)

    print("KERNEL_OK")
</pallas_src>

<mosaic_0001>
module attributes {stable_mosaic.version = 11 : i64} {
  func.func @netlin_kernel(%arg0: i32, %arg1: memref<2x784xf32, #tpu.memory_space<vmem>>, %arg2: memref<784x128xf32, #tpu.memory_space<vmem>>, %arg3: memref<1x128xf32, #tpu.memory_space<vmem>>, %arg4: memref<2x10xf32, #tpu.memory_space<vmem>>) attributes {dimension_semantics = [#tpu.dimension_semantics<parallel>], iteration_bounds = array<i64: 1>, scalar_prefetch = 0 : i64, scratch_operands = 0 : i64, tpu.core_type = #tpu.core_type<tc>, window_params = [{transform_indices = @transform_0, window_bounds = array<i64: 2, 784>}, {pipeline_mode = #tpu.pipeline_mode<synchronous>, transform_indices = @transform_1, window_bounds = array<i64: 784, 128>}, {pipeline_mode = #tpu.pipeline_mode<synchronous>, transform_indices = @transform_2, window_bounds = array<i64: 1, 128>}, {transform_indices = @transform_3, window_bounds = array<i64: 2, 10>}]} {
    %c0 = arith.constant 0 : index
    %c0_0 = arith.constant 0 : index
    %0 = vector.load %arg1[%c0, %c0_0] : memref<2x784xf32, #tpu.memory_space<vmem>>, vector<2x784xf32>
    %c0_1 = arith.constant 0 : index
    %c0_2 = arith.constant 0 : index
    %1 = vector.load %arg2[%c0_1, %c0_2] : memref<784x128xf32, #tpu.memory_space<vmem>>, vector<784x128xf32>
    %cst = arith.constant dense<0.000000e+00> : vector<2x128xf32>
    %2 = tpu.matmul %0, %1, %cst {dimension_numbers = #tpu.dot_dimension_numbers<[1], [0], [0], [1], [0, 0, 1, 1], [], []>} : vector<2x784xf32>, vector<784x128xf32>, vector<2x128xf32> -> vector<2x128xf32>
    %c0_3 = arith.constant 0 : index
    %c0_4 = arith.constant 0 : index
    %3 = vector.load %arg3[%c0_3, %c0_4] : memref<1x128xf32, #tpu.memory_space<vmem>>, vector<1x128xf32>
    %4 = vector.broadcast %3 : vector<1x128xf32> to vector<2x128xf32>
    %5 = arith.addf %2, %4 : vector<2x128xf32>
    %cst_5 = arith.constant dense<0xFF800000> : vector<2xf32>
    %6 = vector.multi_reduction <maximumf>, %5, %cst_5 [1] : vector<2x128xf32> to vector<2xf32>
    %7 = vector.shape_cast %6 : vector<2xf32> to vector<2x1xf32>
    %8 = vector.broadcast %7 : vector<2x1xf32> to vector<2x128xf32>
    %9 = arith.subf %5, %8 : vector<2x128xf32>
    %10 = math.exp %9 : vector<2x128xf32>
    %cst_6 = arith.constant dense<0.000000e+00> : vector<2xf32>
    %11 = vector.multi_reduction <add>, %10, %cst_6 [1] : vector<2x128xf32> to vector<2xf32>
    %12 = vector.shape_cast %11 : vector<2xf32> to vector<2x1xf32>
    %13 = math.log %12 : vector<2x1xf32>
    %14 = vector.broadcast %13 : vector<2x1xf32> to vector<2x128xf32>
    %15 = arith.subf %9, %14 : vector<2x128xf32>
    %16 = vector.extract_strided_slice %15 {offsets = [0, 0], sizes = [2, 10], strides = [1, 1]} : vector<2x128xf32> to vector<2x10xf32>
    %c0_7 = arith.constant 0 : index
    %c0_8 = arith.constant 0 : index
    %17 = vector.load %arg4[%c0_7, %c0_8] : memref<2x10xf32, #tpu.memory_space<vmem>>, vector<2x10xf32>
    tpu.vector_store %arg4[%c0_7, %c0_8], %16 {strides = array<i32>} : memref<2x10xf32, #tpu.memory_space<vmem>>, vector<2x10xf32>,
    return
  }
  func.func @transform_0(%arg0: i32) -> (i32, i32) {
    %c0_i32 = arith.constant 0 : i32
    %c0_i32_0 = arith.constant 0 : i32
    return %arg0, %c0_i32 : i32, i32
  }
  func.func @transform_1(%arg0: i32) -> (i32, i32) {
    %c0_i32 = arith.constant 0 : i32
    %c0_i32_0 = arith.constant 0 : i32
    %c0_i32_1 = arith.constant 0 : i32
    return %c0_i32, %c0_i32_0 : i32, i32
  }
  func.func @transform_2(%arg0: i32) -> (i32, i32) {
    %c0_i32 = arith.constant 0 : i32
    %c0_i32_0 = arith.constant 0 : i32
    %c0_i32_1 = arith.constant 0 : i32
    return %c0_i32, %c0_i32_0 : i32, i32
  }
  func.func @transform_3(%arg0: i32) -> (i32, i32) {
    %c0_i32 = arith.constant 0 : i32
    %c0_i32_0 = arith.constant 0 : i32
    return %arg0, %c0_i32 : i32, i32
  }
}

</mosaic_0001>

<bundles_post_ra>
// kernel: tpu_custom_call.1
= control target key start
LH: loop header
LB: loop body
LE: loop exit
PB: predicated region body
PF: predicated region fallthrough
CT: control target
= control target key end

     0   :  { %8 = vsyncpa [#allocation3], 0  ;;  %s892_s0 = inlined_call_operand.hbm [shape: f32[2,784], index: 0, kind: input, shape index: {}]   ;;  %s893_s1 = inlined_call_operand.hbm [shape: f32[784,128], index: 1, kind: input, shape index: {}]   ;;  %s894_s2 = inlined_call_operand.vmem [shape: f32[1,128], index: 2, kind: input, shape index: {}]   ;;  %s895_s3 = inlined_call_operand.hbm [shape: f32[2,10], index: 3, kind: output, shape index: {}]  }
   0x1   :  { %9 = vsyncpa [#allocation6], 0 }
   0x2   :  { %10 = vsyncpa [#allocation4], 0  ;;  %s806_s12 = smov [#allocation2]   ;;  %s807_s14 = smov [#allocation5]  }
   0x3   :  { %s17_s13 = sshll.u32 %s806_s12, 4  ;;  %s26_s15 = sshll.u32 %s807_s14, 4  ;;  %s18_s13 = int_to_ptr.vmem [resolvable:$true] %s17_s13  ;;  %s835_s15 = int_to_ptr.vmem [resolvable:$true] %s26_s15 }
   0x4   :  { %s734_s18 = scalar_lea.hbm %s892_s0, 224 }
   0x5   :  { %p735_p0 = scmp.ne.s32.totalorder %s892_s0, %s734_s18  ;;  %p738_p1 = scmp.lt.u32.totalorder %s734_s18, %s892_s0 }
   0x7   :  { %p740_p2 = pnand %p738_p1, %p735_p0 }
   0x9   :  { %743 = shalt.err (!%p740_p2)
}
   0xa   :  { %s744_s23 = scalar_lea.vmem %s18_s13, 224  ;;  %p749_p4 = scmp.lt.s32.totalorder %s18_s13, %s18_s13 }
   0xb   :  { %p745_p3 = scmp.ne.s32.totalorder %s18_s13, %s744_s23  ;;  %p750_p5 = scmp.lt.s32.totalorder %s744_s23, %s744_s23 }
   0xd   :  { %p751_p6 = por %p750_p5, %p749_p4 }
   0xf   :  { %p752_p7 = pnand %p751_p6, %p745_p3 }
  0x11   :  { %755 = shalt.err (!%p752_p7)
}
  0x12   :  { %20 = dma.hbm_to_vmem [thread:$0]  %s892_s0, 224, %s18_s13, [#allocation3]  }
  0x13   :  { %s756_s28 = scalar_lea.hbm %s893_s1, 12544 }
  0x14   :  { %p757_p8 = scmp.ne.s32.totalorder %s893_s1, %s756_s28  ;;  %p760_p9 = scmp.lt.u32.totalorder %s756_s28, %s893_s1 }
  0x16   :  { %p762_p10 = pnand %p760_p9, %p757_p8 }
  0x18   :  { %765 = shalt.err (!%p762_p10)
}
  0x19   :  { %s766_s6 = scalar_lea.vmem %s835_s15, 12544  ;;  %p771_p12 = scmp.lt.s32.totalorder %s835_s15, %s835_s15 }
  0x1a   :  { %p767_p11 = scmp.ne.s32.totalorder %s835_s15, %s766_s6  ;;  %p772_p13 = scmp.lt.s32.totalorder %s766_s6, %s766_s6 }
  0x1c   :  { %p773_p0 = por %p772_p13, %p771_p12 }
  0x1e   :  { %p774_p1 = pnand %p773_p0, %p767_p11 }
  0x20   :  { %777 = shalt.err (!%p774_p1)
}
  0x21   :  { %s808_s0 = smov 128   ;;  %s809_s7 = smov 8  }
  0x22   :  { %32 = dma.hbm_to_vmem [thread:$0]  %s893_s1, 12544, %s835_s15, [#allocation6], %s808_s0, %s808_s0, %s809_s7  }
  0x23   :  { %800 = dma.done.wait [#allocation3], 224  }
  0x24   :  { %801 = vsyncadd [#allocation3], 4294967072 }
  0x25   :  { %802 = dma.done.wait [#allocation6], 12544  }
  0x26   :  { %803 = vsyncadd [#allocation6], 4294954752  ;;  %v59_v0 = vld [vmem:[#allocation5 + $0x80] sm:$0xff]  ;;  %v60_v1 = vld [vmem:[#allocation5 + $0x88] sm:$0xff]  ;;  %v810_v43 = vmov 1983009808   ;;  %v154_v45 = vlaneseq }
  0x27   :  { %v43_v2 = vld [vmem:[#allocation5] sm:$0xff]  ;;  %v620_v3 = vpack.c.bf16 %v60_v1, %v59_v0  ;;  %v44_v4 = vld [vmem:[#allocation5 + $0x8] sm:$0xff]  ;;  %v61_v11 = vld [vmem:[#allocation5 + $0x90] sm:$0xff]  ;;  %v152_v44 = vunpack.c.l.s4 %v810_v43  ;;  %vm812_vm0 = vmmov 0   ;;  %vm189_vm1 = vcmask 130048  }
  0x28   :  { %v91_v5 = vld [vmem:[#allocation5 + $0x180] sm:$0xff]  ;;  %v92_v6 = vld [vmem:[#allocation5 + $0x188] sm:$0xff]  ;;  %v622_v7 = vpack.c.bf16 %v44_v4, %v43_v2  ;;  %v62_v13 = vld [vmem:[#allocation5 + $0x98] sm:$0xff]  ;;  %v155_v60 = vshrl.u32 %v154_v45, 7  ;;  %vm472_vm2 = vcmask 1041408   ;;  %vm485_vm3 = vcmask 74752  }
  0x29   :  { %v652_v8 = vpack.c.bf16 %v92_v6, %v91_v5  ;;  %v75_v9 = vld [vmem:[#allocation5 + $0x100] sm:$0xff]  ;;  %v76_v10 = vld [vmem:[#allocation5 + $0x108] sm:$0xff]  ;;  %621 = vmatprep.subr.bf16.mxu0 %v620_v3  ;;  %v45_v14 = vld [vmem:[#allocation5 + $0x10] sm:$0xff]  ;;  %v624_v16 = vpack.c.bf16 %v62_v13, %v61_v11  ;;  %v153_v59 = vunpack.c.0.s8 %v152_v44 }
  0x2a   :  { %v654_v12 = vpack.c.bf16 %v76_v10, %v75_v9  ;;  %v46_v15 = vld [vmem:[#allocation5 + $0x18] sm:$0xff]  ;;  %623 = vmatpush3.bf16.msra.mxu0 %v622_v7  ;;  %v93_v18 = vld [vmem:[#allocation5 + $0x190] sm:$0xff]  ;;  %v63_v23 = vld [vmem:[#allocation5 + $0xa0] sm:$0xff] }
  0x2b   :  { %653 = vmatprep.subr.bf16.mxu1 %v652_v8  ;;  %v626_v17 = vpack.c.bf16 %v46_v15, %v45_v14  ;;  %v94_v19 = vld [vmem:[#allocation5 + $0x198] sm:$0xff]  ;;  %v77_v20 = vld [vmem:[#allocation5 + $0x110] sm:$0xff]  ;;  %v64_v24 = vld [vmem:[#allocation5 + $0xa8] sm:$0xff]  ;;  %625 = vmatprep.subr.bf16.mxu0 %v624_v16  ;;  %v866_v10 = vsub.s32 %v153_v59, %v155_v60 }
  0x2c   :  { %655 = vmatpush3.bf16.msra.mxu1 %v654_v12  ;;  %v656_v21 = vpack.c.bf16 %v94_v19, %v93_v18  ;;  %v78_v22 = vld [vmem:[#allocation5 + $0x118] sm:$0xff]  ;;  %v628_v26 = vpack.c.bf16 %v64_v24, %v63_v23  ;;  %v47_v27 = vld [vmem:[#allocation5 + $0x20] sm:$0xff]  ;;  %v48_v28 = vld [vmem:[#allocation5 + $0x28] sm:$0xff] }
  0x2d   :  { %v658_v25 = vpack.c.bf16 %v78_v22, %v77_v20  ;;  %v95_v29 = vld [vmem:[#allocation5 + $0x1a0] sm:$0xff]  ;;  %v96_v30 = vld [vmem:[#allocation5 + $0x1a8] sm:$0xff]  ;;  %v630_v33 = vpack.c.bf16 %v48_v28, %v47_v27  ;;  %v65_v35 = vld [vmem:[#allocation5 + $0xb0] sm:$0xff] }
  0x2e   :  { %657 = vmatprep.subr.bf16.mxu1 %v656_v21  ;;  %v79_v31 = vld [vmem:[#allocation5 + $0x120] sm:$0xff]  ;;  %v80_v32 = vld [vmem:[#allocation5 + $0x128] sm:$0xff]  ;;  %627 = vmatpush3.bf16.msra.mxu0 %v626_v17  ;;  %v660_v34 = vpack.c.bf16 %v96_v30, %v95_v29  ;;  %v66_v36 = vld [vmem:[#allocation5 + $0xb8] sm:$0xff] }
  0x2f   :  { %v49_v37 = vld [vmem:[#allocation5 + $0x30] sm:$0xff]  ;;  %629 = vmatprep.subr.bf16.mxu0 %v628_v26  ;;  %v662_v38 = vpack.c.bf16 %v80_v32, %v79_v31  ;;  %v632_v39 = vpack.c.bf16 %v66_v36, %v65_v35  ;;  %v50_v40 = vld [vmem:[#allocation5 + $0x38] sm:$0xff]  ;;  %v67_v49 = vld [vmem:[#allocation5 + $0xc0] sm:$0xff] }
  0x30   :  { %659 = vmatpush3.bf16.msra.mxu1 %v658_v25  ;;  %v97_v41 = vld [vmem:[#allocation5 + $0x1b0] sm:$0xff]  ;;  %v98_v42 = vld [vmem:[#allocation5 + $0x1b8] sm:$0xff]  ;;  %v68_v50 = vld [vmem:[#allocation5 + $0xc8] sm:$0xff]  ;;  %v634_v51 = vpack.c.bf16 %v50_v40, %v49_v37 }
  0x31   :  { %661 = vmatprep.subr.bf16.mxu1 %v660_v34  ;;  %v664_v46 = vpack.c.bf16 %v98_v42, %v97_v41  ;;  %v81_v47 = vld [vmem:[#allocation5 + $0x130] sm:$0xff]  ;;  %v82_v48 = vld [vmem:[#allocation5 + $0x138] sm:$0xff]  ;;  %v99_v52 = vld [vmem:[#allocation5 + $0x1c0] sm:$0xff]  ;;  %v636_v55 = vpack.c.bf16 %v68_v50, %v67_v49 }
  0x32   :  { %631 = vmatpush3.bf16.msra.mxu0 %v630_v33  ;;  %v100_v53 = vld [vmem:[#allocation5 + $0x1c8] sm:$0xff]  ;;  %v666_v54 = vpack.c.bf16 %v82_v48, %v81_v47  ;;  %v51_v56 = vld [vmem:[#allocation5 + $0x40] sm:$0xff]  ;;  %v69_v63 = vld [vmem:[#allocation5 + $0xd0] sm:$0xff] }
  0x33   :  { %633 = vmatprep.subr.bf16.mxu0 %v632_v39  ;;  %v52_v57 = vld [vmem:[#allocation5 + $0x48] sm:$0xff]  ;;  %v83_v58 = vld [vmem:[#allocation5 + $0x140] sm:$0xff]  ;;  %v668_v61 = vpack.c.bf16 %v100_v53, %v99_v52  ;;  %v70_v0 = vld [vmem:[#allocation5 + $0xd8] sm:$0xff] }
  0x34   :  { %663 = vmatpush3.bf16.msra.mxu1 %v662_v38  ;;  %v84_v62 = vld [vmem:[#allocation5 + $0x148] sm:$0xff]  ;;  %v101_v1 = vld [vmem:[#allocation5 + $0x1d0] sm:$0xff]  ;;  %v102_v2 = vld [vmem:[#allocation5 + $0x1d8] sm:$0xff]  ;;  %v638_v3 = vpack.c.bf16 %v52_v57, %v51_v56  ;;  %v640_v6 = vpack.c.bf16 %v70_v0, %v69_v63 }
  0x35   :  { %665 = vmatprep.subr.bf16.mxu1 %v664_v46  ;;  %v53_v4 = vld [vmem:[#allocation5 + $0x50] sm:$0xff]  ;;  %v670_v5 = vpack.c.bf16 %v84_v62, %v83_v58  ;;  %v54_v7 = vld [vmem:[#allocation5 + $0x58] sm:$0xff]  ;;  %v672_v11 = vpack.c.bf16 %v102_v2, %v101_v1  ;;  %v71_v12 = vld [vmem:[#allocation5 + $0xe0] sm:$0xff]  ;;  %v811_v62 = vmov 0.0|0.0  }
  0x36   :  { %635 = vmatpush3.bf16.msra.mxu0 %v634_v51  ;;  %v85_v8 = vld [vmem:[#allocation5 + $0x150] sm:$0xff]  ;;  %v86_v9 = vld [vmem:[#allocation5 + $0x158] sm:$0xff]  ;;  %v72_v13 = vld [vmem:[#allocation5 + $0xe8] sm:$0xff]  ;;  %v642_v16 = vpack.c.bf16 %v54_v7, %v53_v4 }
  0x37   :  { %637 = vmatprep.subr.bf16.mxu0 %v636_v55  ;;  %v103_v14 = vld [vmem:[#allocation5 + $0x1e0] sm:$0xff]  ;;  %v104_v15 = vld [vmem:[#allocation5 + $0x1e8] sm:$0xff]  ;;  %v674_v17 = vpack.c.bf16 %v86_v9, %v85_v8  ;;  %v41_v18 = vld [vmem:[#allocation2] sm:$0xff]  ;;  %v644_v19 = vpack.c.bf16 %v72_v13, %v71_v12  ;;  %v813_v8 = vmov 0.0  }
  0x38   :  { %667 = vmatpush3.bf16.msra.mxu1 %v666_v54  ;;  %v55_v20 = vld [vmem:[#allocation5 + $0x60] sm:$0xff]  ;;  %v56_v21 = vld [vmem:[#allocation5 + $0x68] sm:$0xff]  ;;  %v157_v23 = vrot.slane %v41_v18, %v866_v10  ;;  %v150_v24 = vcombine.high %v41_v18, %v41_v18  ;;  %v676_v25 = vpack.c.bf16 %v104_v15, %v103_v14  ;;  %v73_v27 = vld [vmem:[#allocation5 + $0xf0] sm:$0xff] }
  0x39   :  { %669 = vmatprep.subr.bf16.mxu1 %v668_v61  ;;  %v87_v22 = vld [vmem:[#allocation5 + $0x160] sm:$0xff]  ;;  %v88_v26 = vld [vmem:[#allocation5 + $0x168] sm:$0xff]  ;;  %v74_v28 = vld [vmem:[#allocation5 + $0xf8] sm:$0xff]  ;;  %v646_v33 = vpack.c.bf16 %v56_v21, %v55_v20 }
  0x3a   :  { %639 = vmatpush3.bf16.msra.mxu0 %v638_v3  ;;  %v105_v29 = vld [vmem:[#allocation5 + $0x1f0] sm:$0xff]  ;;  %v106_v30 = vld [vmem:[#allocation5 + $0x1f8] sm:$0xff]  ;;  %v165_v31 = vcombine.high %v157_v23, %v157_v23  ;;  %v164_v32 = vrot.slane %v150_v24, %v866_v10  ;;  %v678_v34 = vpack.c.bf16 %v88_v26, %v87_v22  ;;  %v648_v35 = vpack.c.bf16 %v74_v28, %v73_v27  ;;  %v123_v42 = vld [vmem:[#allocation5 + $0x280] sm:$0xff] }
  0x3b   :  { %641 = vmatprep.subr.bf16.mxu0 %v640_v6  ;;  %v57_v36 = vld [vmem:[#allocation5 + $0x70] sm:$0xff]  ;;  %v58_v37 = vld [vmem:[#allocation5 + $0x78] sm:$0xff]  ;;  %v680_v40 = vpack.c.bf16 %v106_v30, %v105_v29  ;;  %v124_v43 = vld [vmem:[#allocation5 + $0x288] sm:$0xff] }
  0x3c   :  { %671 = vmatpush3.bf16.msra.mxu1 %v670_v5  ;;  %v89_v38 = vld [vmem:[#allocation5 + $0x170] sm:$0xff]  ;;  %v166_v39 = vcombine.high %v164_v32, %v164_v32  ;;  %256 = vmatprep.mubr.f32.mxu0 %v165_v31  ;;  %v90_v41 = vld [vmem:[#allocation5 + $0x178] sm:$0xff]  ;;  %v650_v44 = vpack.c.bf16 %v58_v37, %v57_v36  ;;  %v684_v46 = vpack.c.bf16 %v124_v43, %v123_v42  ;;  %v107_v47 = vld [vmem:[#allocation5 + $0x200] sm:$0xff] }
  0x3d   :  { %673 = vmatprep.subr.bf16.mxu1 %v672_v11  ;;  %v682_v45 = vpack.c.bf16 %v90_v41, %v89_v38  ;;  %v108_v48 = vld [vmem:[#allocation5 + $0x208] sm:$0xff]  ;;  %v125_v49 = vld [vmem:[#allocation5 + $0x290] sm:$0xff]  ;;  %v126_v50 = vld [vmem:[#allocation5 + $0x298] sm:$0xff] }
  0x3e   :  { %643 = vmatpush3.bf16.msra.mxu0 %v642_v16  ;;  %326 = vmatprep.mubr.f32.mxu1 %v166_v39  ;;  %v686_v51 = vpack.c.bf16 %v108_v48, %v107_v47  ;;  %v42_v52 = vld [vmem:[#allocation2 + $0x8] sm:$0x3f]  ;;  %v139_v53 = vld [vmem:[#allocation5 + $0x300] sm:$0xff]  ;;  %v688_v54 = vpack.c.bf16 %v126_v50, %v125_v49  ;;  %v109_v55 = vld [vmem:[#allocation5 + $0x210] sm:$0xff] }
  0x3f   :  { %645 = vmatprep.subr.bf16.mxu0 %v644_v19  ;;  %v110_v56 = vld [vmem:[#allocation5 + $0x218] sm:$0xff]  ;;  %v167_v57 = vcombine.high %v42_v52, %v42_v52  ;;  %v871_v58 = vrot.slane %v42_v52, %v866_v10  ;;  %v140_v59 = vld [vmem:[#allocation5 + $0x308] sm:$0xff]  ;;  %v127_v60 = vld [vmem:[#allocation5 + $0x2a0] sm:$0xff] }
  0x40   :  { %675 = vmatpush3.bf16.msra.mxu1 %v674_v17  ;;  %v128_v61 = vld [vmem:[#allocation5 + $0x2a8] sm:$0xff]  ;;  %v717_v63 = vpack.c.bf16 %v140_v59, %v139_v53  ;;  %v690_v1 = vpack.c.bf16 %v110_v56, %v109_v55  ;;  %v111_v3 = vld [vmem:[#allocation5 + $0x220] sm:$0xff]  ;;  %v129_v6 = vld [vmem:[#allocation5 + $0x2b0] sm:$0xff] }
  0x41   :  { %677 = vmatprep.subr.bf16.mxu1 %v676_v25  ;;  %v182_v0 = vcombine.high %v871_v58, %v871_v58  ;;  %v692_v2 = vpack.c.bf16 %v128_v61, %v127_v60  ;;  %v112_v4 = vld [vmem:[#allocation5 + $0x228] sm:$0xff]  ;;  %v181_v5 = vrot.slane %v167_v57, %v866_v10  ;;  %v130_v7 = vld [vmem:[#allocation5 + $0x2b8] sm:$0xff]  ;;  %v113_v12 = vld [vmem:[#allocation5 + $0x230] sm:$0xff] }
  0x42   :  { %647 = vmatpush3.bf16.msra.mxu0 %v646_v33  ;;  %v694_v9 = vpack.c.bf16 %v112_v4, %v111_v3  ;;  %v696_v11 = vpack.c.bf16 %v130_v7, %v129_v6  ;;  %v114_v13 = vld [vmem:[#allocation5 + $0x238] sm:$0xff]  ;;  %v131_v14 = vld [vmem:[#allocation5 + $0x2c0] sm:$0xff]  ;;  %v132_v15 = vld [vmem:[#allocation5 + $0x2c8] sm:$0xff] }
  0x43   :  { %649 = vmatprep.subr.bf16.mxu0 %v648_v35  ;;  %v698_v16 = vpack.c.bf16 %v114_v13, %v113_v12  ;;  %v700_v10 = vpack.c.bf16 %v132_v15, %v131_v14  ;;  %v115_v17 = vld [vmem:[#allocation5 + $0x240] sm:$0xff]  ;;  %v116_v18 = vld [vmem:[#allocation5 + $0x248] sm:$0xff]  ;;  %v133_v19 = vld [vmem:[#allocation5 + $0x2d0] sm:$0xff] }
  0x44   :  { %679 = vmatpush3.bf16.msra.mxu1 %v678_v34  ;;  %v134_v20 = vld [vmem:[#allocation5 + $0x2d8] sm:$0xff]  ;;  %v702_v21 = vpack.c.bf16 %v116_v18, %v115_v17  ;;  %v135_v25 = vld [vmem:[#allocation5 + $0x2e0] sm:$0xff]  ;;  %v136_v26 = vld [vmem:[#allocation5 + $0x2e8] sm:$0xff] }
  0x45   :  { %681 = vmatprep.subr.bf16.mxu1 %v680_v40  ;;  %v704_v22 = vpack.c.bf16 %v134_v20, %v133_v19  ;;  %v118_v24 = vld [vmem:[#allocation5 + $0x258] sm:$0xff]  ;;  %v708_v28 = vpack.c.bf16 %v136_v26, %v135_v25  ;;  %v119_v29 = vld [vmem:[#allocation5 + $0x260] sm:$0xff]  ;;  %v120_v30 = vld [vmem:[#allocation5 + $0x268] sm:$0xff] }
  0x46   :  { %651 = vmatpush3.bf16.msra.mxu0 %v650_v44  ;;  %v137_v31 = vld [vmem:[#allocation5 + $0x2f0] sm:$0xff]  ;;  %v710_v33 = vpack.c.bf16 %v120_v30, %v119_v29  ;;  %v122_v36 = vld [vmem:[#allocation5 + $0x278] sm:$0xff] }
  0x47   :  { %685 = vmatprep.subr.bf16.mxu0 %v684_v46  ;;  %v121_v35 = vld [vmem:[#allocation5 + $0x270] sm:$0xff] }
  0x48   :  { %683 = vmatpush3.bf16.msra.mxu1 %v682_v45  ;;  %v714_v37 = vpack.c.bf16 %v122_v36, %v121_v35  ;;  %v503_v39 = vld [vmem:[%s894_s2] ss:$0 sm:$0xff]  ;;  %s814_s2 = smov [#allocation7]  }
  0x49   :  { %716 = vmatprep.subr.bf16.mxu1 %v811_v62  ;;  %257 = vmatmul.mubr.f32.vlgmr.msra.gmra.mrb[0].mxu0 %v157_v23  ;;  %v117_v23 = vld [vmem:[#allocation5 + $0x250] sm:$0xff]  ;;  %s493_s11 = sshll.u32 %s814_s2, 4  ;;  %s494_s11 = int_to_ptr.vmem [resolvable:$true] %s493_s11 }
  0x4a   :  { %687 = vmatpush3.bf16.msra.mxu0 %v686_v51  ;;  %396 = vmatprep.mubr.f32.mxu0 %v182_v0  ;;  %v706_v27 = vpack.c.bf16 %v118_v24, %v117_v23  ;;  %s778_s12 = scalar_lea.vmem %s494_s11, 32  ;;  %p783_p3 = scmp.lt.s32.totalorder %s494_s11, %s494_s11 }
  0x4b   :  { %327 = vmatmul.mubr.f32.vlgmr.msra.gmra.mrb[0].mxu1 %v164_v32  ;;  %689 = vmatprep.subr.bf16.mxu0 %v688_v54  ;;  %v138_v32 = vld [vmem:[#allocation5 + $0x2f8] sm:$0xff]  ;;  %p779_p2 = scmp.ne.s32.totalorder %s494_s11, %s778_s12  ;;  %p784_p4 = scmp.lt.s32.totalorder %s778_s12, %s778_s12 }
  0x4c   :  { %718 = vmatpush3.bf16.msra.mxu1 %v717_v63  ;;  %617 = vmatprep.mubr.msk.f32.mxu1 %vm812_vm0, %v813_v8  ;;  %v712_v34 = vpack.c.bf16 %v138_v32, %v137_v31 }
  0x4d   :  { %p785_p5 = por %p784_p4, %p783_p3 }
  0x4e   :  { %691 = vmatpush3.bf16.msra.mxu0 %v690_v1 }
  0x4f   :  { %693 = vmatprep.subr.bf16.mxu0 %v692_v2  ;;  %618 = vmatmul.mubr.msk.f32.vlgmr.msra.gmra.mrb[2].mxu1 %vm189_vm1, %v181_v5  ;;  %p786_p6 = pnand %p785_p5, %p779_p2 }
  0x52   :  { %695 = vmatpush3.bf16.msra.mxu0 %v694_v9 }
  0x53   :  { %697 = vmatprep.subr.bf16.mxu0 %v696_v11 }
  0x56   :  { %699 = vmatpush3.bf16.msra.mxu0 %v698_v16 }
  0x57   :  { %701 = vmatprep.subr.bf16.mxu0 %v700_v10 }
  0x5a   :  { %703 = vmatpush3.bf16.msra.mxu0 %v702_v21 }
  0x5b   :  { %705 = vmatprep.subr.bf16.mxu0 %v704_v22 }
  0x5e   :  { %707 = vmatpush3.bf16.msra.mxu0 %v706_v27 }
  0x5f   :  { %709 = vmatprep.subr.bf16.mxu0 %v708_v28 }
  0x62   :  { %711 = vmatpush3.bf16.msra.mxu0 %v710_v33 }
  0x63   :  { %713 = vmatprep.subr.bf16.mxu0 %v712_v34 }
  0x66   :  { %715 = vmatpush3.bf16.msra.mxu0 %v714_v37 }
  0x69   :  { %397 = vmatmul.mubr.f32.vlgmr.msra.gmra.mrb[2].mxu0 %v871_v58 }
 0x11c   :  { %v537_v38 = vpop.f32.mrb[0].mxu0 }
 0x11d   :  { %v538_v40 = vpop.f32.mrb[1].mxu0 }
 0x11e   :  { %v572_v41 = vpop.f32.mrb[0].mxu1  ;;  %v539_v42 = vadd.f32 %v538_v40, %v537_v38 }
 0x11f   :  { %v573_v43 = vpop.f32.mrb[1].mxu1 }
 0x120   :  { %v574_v44 = vadd.f32 %v573_v43, %v572_v41  ;;  %v259_v45 = vadd.f32 %v539_v42, %v503_v39 }
 0x122   :  { %v329_v46 = vadd.f32 %v574_v44, %v259_v45  ;;  %v468_v47 = vpop.f32.mrb[2].mxu1 }
 0x123   :  { %v619_v48 = vpop.f32.mrb[3].mxu1 }
 0x13c   :  { %v607_v49 = vpop.f32.mrb[2].mxu0 }
 0x13d   :  { %v608_v50 = vpop.f32.mrb[3].mxu0 }
 0x13e   :  { %v609_v51 = vadd.f32 %v608_v50, %v607_v49 }
 0x140   :  { %v399_v52 = vadd.f32 %v609_v51, %v329_v46 }
 0x142   :  { %v469_v53 = vadd.f32 %v468_v47, %v399_v52 }
 0x144   :  { %v473_v54 = vsel %vm472_vm2, %v469_v53, -inf }
 0x145   :  { %474 = vmax.xlane.f32.xlu0 %v473_v54 }
 0x1d2   :  { %v475_v55 = vpop.xlane.xlu0 %474 }
 0x1d3   :  { %v476_v56 = vsub.f32 %v469_v53, %v475_v55 }
 0x1d5   :  { %v477_v57 = vmul.f32 1.442695, %v476_v56 }
 0x1d7   :  { %730 = vpow2.f32 %v477_v57 }
 0x1e1   :  { %v731_v58 = vpop.eup %730 }
 0x1e2   :  { %v479_v59 = vsel %vm472_vm2, %v731_v58, 0.0 }
 0x1e3   :  { %480 = vadd.xlane.f32.xlu0 %v479_v59 }
 0x270   :  { %v481_v60 = vpop.xlane.xlu0 %480 }
 0x271   :  { %732 = vlog2.f32 %v481_v60 }
 0x27b   :  { %v733_v61 = vpop.eup %732 }
 0x27c   :  { %v483_v62 = vmul.f32 0.6931472, %v733_v61 }
 0x27e   :  { %v484_v63 = vsub.f32 %v476_v56, %v483_v62 }
 0x280   :  { %486 = vst.msk [vmem:[#allocation7] sm:$0x3] %vm485_vm3, %v484_v63 }
 0x281   :  { %789 = shalt.err (!%p786_p6)
}
 0x282   :  { %s790_s15 = scalar_lea.hbm %s895_s3, 32 }
 0x283   :  { %p791_p7 = scmp.ne.s32.totalorder %s895_s3, %s790_s15  ;;  %p794_p8 = scmp.lt.u32.totalorder %s790_s15, %s895_s3 }
 0x285   :  { %p796_p9 = pnand %p794_p8, %p791_p7 }
 0x287   :  { %799 = shalt.err (!%p796_p9)
}
 0x288   :  { %496 = dma.vmem_to_hbm [thread:$0]  %s494_s11, 32, %s895_s3, [#allocation4]  }
 0x289   :  { %804 = dma.done.wait [#allocation4], 32  }
 0x28a   :  { %805 = vsyncadd [#allocation4], 4294967264 }
 0x28b   :  { %500 = vsyncpa [#allocation3], 1 }
 0x28c   :  { %501 = vsyncpa [#allocation6], 1 }
 0x28d   :  { %502 = vsyncpa [#allocation4], 1 }

</bundles_post_ra>
